<compile_context>
chip_gen: v7x
topology: tpu7x:2x2x1
jax: 0.10.0
libtpu: 0.0.40
codegen_flags: <defaults>
</compile_context>

<pallas_src>
import jax
import jax.numpy as jnp
from jax.experimental import pallas as pl
from jax.experimental.pallas import tpu as pltpu


def _cdiv(a, b):
    return -(-a // b)


def _round_up(a, m):
    return _cdiv(a, m) * m


def make_fusion_kernel(n_views):
    """Build the fused kernel for a fixed (static) number of views."""
    V = n_views

    def kernel(*refs):
        view_refs = refs[:V]          # V x (tb, D)  per-view embeddings
        w_t_ref = refs[V]             # (D, V)       attention weight, transposed
        b_ref = refs[V + 1]           # (1, V)       attention bias
        enc_ref = refs[V + 2]         # (V, D)       positional encodings
        joint_ref = refs[V + 3]       # (tb, D)      output: joint_rep
        att_ref = refs[V + 4]         # (tb, V)      output: softmax attention

        enc = enc_ref[...]            # (V, D), resident tiny constant

        # --- mean over pos-encoded views (exact f32, VPU) -------------------------
        acc = None
        for v in range(V):
            xv = view_refs[v][...] + enc[v:v + 1, :]          # (tb, D)
            acc = xv if acc is None else acc + xv
        mean = acc * (1.0 / V)                                # (tb, D)

        # --- adaptive attention logits: mean @ W_att.T + b ------------------------
        # Tiny (tb,D)x(D,V) matmul; precision=HIGHEST keeps it f32-exact so it
        # matches the reference at 1e-3 tolerance (MXU utilization is irrelevant:
        # the kernel is HBM-bandwidth bound).
        logits = jnp.dot(mean, w_t_ref[...],
                         preferred_element_type=jnp.float32,
                         precision=jax.lax.Precision.HIGHEST) + b_ref[...]   # (tb, V)

        # --- softmax over views (exact divide, not approx reciprocal) --------------
        m = jnp.max(logits, axis=-1, keepdims=True)
        e = jnp.exp(logits - m)
        att = e / jnp.sum(e, axis=-1, keepdims=True)          # (tb, V)

        # --- attention-weighted sum of pos-encoded views (exact f32, VPU) ----------
        joint = None
        for v in range(V):
            xv = view_refs[v][...] + enc[v:v + 1, :]          # re-read ref (cheap)
            contrib = xv * att[:, v:v + 1]                    # lane-broadcast of att_v
            joint = contrib if joint is None else joint + contrib

        joint_ref[...] = joint
        att_ref[...] = att

    return kernel


def fusion_forward(views_emb, views_available, w_pos, w_att, b_att, *, tb=8192):
    """Complete-views forward of FusionModuleMissing (avg + adaptive + pos_encoding).

    views_emb: list of V arrays, each (B, D)
    views_available: (V,) ones (complete-views path only)
    w_pos: (D, V)  pos_encoder.weight        (nn.Linear(V, D, bias=False))
    w_att: (V, D)  attention_function.weight (nn.Linear(D, V, bias=True))
    b_att: (V,)    attention_function.bias
    """
    del views_available  # TODO(synk): missing-view masking path not implemented

    V = len(views_emb)
    B, D = views_emb[0].shape

    # No stack/reshape/pad of the bulk data: the V views are streamed as-is.
    views = [jnp.asarray(v, dtype=jnp.float32) for v in views_emb]
    enc = jnp.transpose(jnp.asarray(w_pos, jnp.float32))       # (V, D) tiny constant
    w_att_t = jnp.transpose(jnp.asarray(w_att, jnp.float32))   # (D, V) tiny constant
    b_row = jnp.asarray(b_att, jnp.float32).reshape(1, V)      # (1, V) tiny constant

    # ---- tiling --------------------------------------------------------------------
    # Single full-array block when B fits in one tile (no (8,128) issue: the block then
    # equals the full array dims); otherwise multiple-of-8 tiles with a masked tail.
    if B <= tb:
        tb_eff = B
    else:
        tb_eff = _round_up(min(tb, B), 8)
    grid = _cdiv(B, tb_eff)
    # v7x megacore: prefer an even number of grid steps so both TensorCores get equal
    # work (single-TC v5e/v6e are unaffected; we never force extra steps for them).
    if grid > 1 and grid % 2 == 1:
        tb_eff = _round_up(_cdiv(B, grid + 1), 8)
        grid = _cdiv(B, tb_eff)

    # VMEM budget (double-buffered): ~ tb_eff * (V*D + D + V) * 8 bytes.
    # Default tb=8192, V=4, D=32 -> ~10.5 MiB: fits every chip's scoped-VMEM default
    # (v5e 16 MiB, v6e/v7x 32 MiB). Raise vmem_limit_bytes only for larger sweeps.

    view_spec = pl.BlockSpec((tb_eff, D), lambda i: (i, 0))

    def const_spec(shape):
        return pl.BlockSpec(shape, lambda i: (0, 0))

    joint, att = pl.pallas_call(
        make_fusion_kernel(V),
        out_shape=(jax.ShapeDtypeStruct((B, D), jnp.float32),
                   jax.ShapeDtypeStruct((B, V), jnp.float32)),
        grid_spec=pltpu.PrefetchScalarGridSpec(
            num_scalar_prefetch=0,
            grid=(grid,),
            in_specs=[view_spec] * V + [
                const_spec((D, V)),   # W_att.T   (resident, ~512 B)
                const_spec((1, V)),   # bias      (resident)
                const_spec((V, D)),   # encodings (resident)
            ],
            out_specs=[
                pl.BlockSpec((tb_eff, D), lambda i: (i, 0)),
                pl.BlockSpec((tb_eff, V), lambda i: (i, 0)),
            ],
        ),
        compiler_params=pltpu.CompilerParams(dimension_semantics=("parallel",)),
    )(*views, w_att_t, b_row, enc)

    # features=False => att_views has a trailing singleton, shape (B, V, 1)
    return {"joint_rep": joint, "att_views": att[:, :, None]}


def _reference(views_emb, w_pos, w_att, b_att):
    views = jnp.stack(views_emb, axis=1)                       # (B, V, D)
    enc = w_pos.T                                              # (V, D)
    xp = views + enc[None, :, :]
    joint_mean = jnp.mean(xp, axis=1)
    logits = jnp.dot(joint_mean, w_att.T,
                     precision=jax.lax.Precision.HIGHEST) + b_att[None, :]
    att = jax.nn.softmax(logits, axis=-1)
    joint = jnp.sum(xp * att[:, :, None], axis=1)
    return joint, att[:, :, None]


if __name__ == "__main__":
    def run_case(B, V, D, tb, key):
        k_x, k_pos, k_w, k_b = jax.random.split(key, 4)
        views = jax.random.normal(k_x, (B, V, D), dtype=jnp.float32)
        views_emb = [views[:, i, :] for i in range(V)]
        views_available = jnp.ones((V,), dtype=jnp.float32)

        # deterministic synthetic parameters (shapes per nn.Linear in __init__)
        w_pos = 0.1 * jax.random.normal(k_pos, (D, V), dtype=jnp.float32)
        w_att = 0.1 * jax.random.normal(k_w, (V, D), dtype=jnp.float32)
        b_att = 0.1 * jax.random.normal(k_b, (V,), dtype=jnp.float32)

        out = fusion_forward(views_emb, views_available, w_pos, w_att, b_att, tb=tb)
        joint = jax.block_until_ready(out["joint_rep"])
        att = jax.block_until_ready(out["att_views"])

        ref_joint, ref_att = _reference(views_emb, w_pos, w_att, b_att)
        assert joint.shape == (B, D) and att.shape == (B, V, 1)
        assert jnp.allclose(joint, ref_joint, atol=1e-3, rtol=1e-3), ("joint", B, V, D, tb)
        assert jnp.allclose(att, ref_att, atol=1e-3, rtol=1e-3), ("att", B, V, D, tb)

    key = jax.random.PRNGKey(0)
    keys = jax.random.split(key, 3)
    run_case(12, 4, 32, 8192, keys[0])   # single block (block == full array dims)
    run_case(24, 4, 32, 8, keys[1])      # multi-step grid, exact coverage
    run_case(20, 4, 32, 8, keys[2])      # multi-step grid with masked partial tail block

    print("KERNEL_OK")
</pallas_src>

<mosaic_0001>
module attributes {stable_mosaic.version = 11 : i64} {
  func.func @kernel(%arg0: i32, %arg1: memref<12x32xf32, #tpu.memory_space<vmem>>, %arg2: memref<12x32xf32, #tpu.memory_space<vmem>>, %arg3: memref<12x32xf32, #tpu.memory_space<vmem>>, %arg4: memref<12x32xf32, #tpu.memory_space<vmem>>, %arg5: memref<32x4xf32, #tpu.memory_space<vmem>>, %arg6: memref<1x4xf32, #tpu.memory_space<vmem>>, %arg7: memref<4x32xf32, #tpu.memory_space<vmem>>, %arg8: memref<12x32xf32, #tpu.memory_space<vmem>>, %arg9: memref<12x4xf32, #tpu.memory_space<vmem>>) attributes {dimension_semantics = [#tpu.dimension_semantics<parallel>], iteration_bounds = array<i64: 1>, scalar_prefetch = 0 : i64, scratch_operands = 0 : i64, tpu.core_type = #tpu.core_type<tc>, window_params = [{transform_indices = @transform_0, window_bounds = array<i64: 12, 32>}, {transform_indices = @transform_1, window_bounds = array<i64: 12, 32>}, {transform_indices = @transform_2, window_bounds = array<i64: 12, 32>}, {transform_indices = @transform_3, window_bounds = array<i64: 12, 32>}, {pipeline_mode = #tpu.pipeline_mode<synchronous>, transform_indices = @transform_4, window_bounds = array<i64: 32, 4>}, {pipeline_mode = #tpu.pipeline_mode<synchronous>, transform_indices = @transform_5, window_bounds = array<i64: 1, 4>}, {pipeline_mode = #tpu.pipeline_mode<synchronous>, transform_indices = @transform_6, window_bounds = array<i64: 4, 32>}, {transform_indices = @transform_7, window_bounds = array<i64: 12, 32>}, {transform_indices = @transform_8, window_bounds = array<i64: 12, 4>}]} {
    %c0 = arith.constant 0 : index
    %c0_0 = arith.constant 0 : index
    %0 = vector.load %arg7[%c0, %c0_0] : memref<4x32xf32, #tpu.memory_space<vmem>>, vector<4x32xf32>
    %c0_1 = arith.constant 0 : index
    %c0_2 = arith.constant 0 : index
    %1 = vector.load %arg1[%c0_1, %c0_2] : memref<12x32xf32, #tpu.memory_space<vmem>>, vector<12x32xf32>
    %2 = vector.extract_strided_slice %0 {offsets = [0, 0], sizes = [1, 32], strides = [1, 1]} : vector<4x32xf32> to vector<1x32xf32>
    %3 = vector.broadcast %2 : vector<1x32xf32> to vector<12x32xf32>
    %4 = arith.addf %1, %3 : vector<12x32xf32>
    %c0_3 = arith.constant 0 : index
    %c0_4 = arith.constant 0 : index
    %5 = vector.load %arg2[%c0_3, %c0_4] : memref<12x32xf32, #tpu.memory_space<vmem>>, vector<12x32xf32>
    %6 = vector.extract_strided_slice %0 {offsets = [1, 0], sizes = [1, 32], strides = [1, 1]} : vector<4x32xf32> to vector<1x32xf32>
    %7 = vector.broadcast %6 : vector<1x32xf32> to vector<12x32xf32>
    %8 = arith.addf %5, %7 : vector<12x32xf32>
    %9 = arith.addf %4, %8 : vector<12x32xf32>
    %c0_5 = arith.constant 0 : index
    %c0_6 = arith.constant 0 : index
    %10 = vector.load %arg3[%c0_5, %c0_6] : memref<12x32xf32, #tpu.memory_space<vmem>>, vector<12x32xf32>
    %11 = vector.extract_strided_slice %0 {offsets = [2, 0], sizes = [1, 32], strides = [1, 1]} : vector<4x32xf32> to vector<1x32xf32>
    %12 = vector.broadcast %11 : vector<1x32xf32> to vector<12x32xf32>
    %13 = arith.addf %10, %12 : vector<12x32xf32>
    %14 = arith.addf %9, %13 : vector<12x32xf32>
    %c0_7 = arith.constant 0 : index
    %c0_8 = arith.constant 0 : index
    %15 = vector.load %arg4[%c0_7, %c0_8] : memref<12x32xf32, #tpu.memory_space<vmem>>, vector<12x32xf32>
    %16 = vector.extract_strided_slice %0 {offsets = [3, 0], sizes = [1, 32], strides = [1, 1]} : vector<4x32xf32> to vector<1x32xf32>
    %17 = vector.broadcast %16 : vector<1x32xf32> to vector<12x32xf32>
    %18 = arith.addf %15, %17 : vector<12x32xf32>
    %19 = arith.addf %14, %18 : vector<12x32xf32>
    %cst = arith.constant 2.500000e-01 : f32
    %20 = vector.broadcast %cst : f32 to vector<12x32xf32>
    %21 = arith.mulf %19, %20 : vector<12x32xf32>
    %c0_9 = arith.constant 0 : index
    %c0_10 = arith.constant 0 : index
    %22 = vector.load %arg5[%c0_9, %c0_10] : memref<32x4xf32, #tpu.memory_space<vmem>>, vector<32x4xf32>
    %cst_11 = arith.constant dense<0.000000e+00> : vector<12x4xf32>
    %23 = tpu.matmul %21, %22, %cst_11 {dimension_numbers = #tpu.dot_dimension_numbers<[1], [0], [0], [1], [0, 0, 1, 1], [], []>, precision = #tpu.contract_precision<fp32>} : vector<12x32xf32>, vector<32x4xf32>, vector<12x4xf32> -> vector<12x4xf32>
    %c0_12 = arith.constant 0 : index
    %c0_13 = arith.constant 0 : index
    %24 = vector.load %arg6[%c0_12, %c0_13] : memref<1x4xf32, #tpu.memory_space<vmem>>, vector<1x4xf32>
    %25 = vector.broadcast %24 : vector<1x4xf32> to vector<12x4xf32>
    %26 = arith.addf %23, %25 : vector<12x4xf32>
    %cst_14 = arith.constant dense<0xFF800000> : vector<12xf32>
    %27 = vector.multi_reduction <maximumf>, %26, %cst_14 [1] : vector<12x4xf32> to vector<12xf32>
    %28 = vector.shape_cast %27 : vector<12xf32> to vector<12x1xf32>
    %29 = vector.broadcast %28 : vector<12x1xf32> to vector<12x4xf32>
    %30 = arith.subf %26, %29 : vector<12x4xf32>
    %31 = math.exp %30 : vector<12x4xf32>
    %cst_15 = arith.constant dense<0.000000e+00> : vector<12xf32>
    %32 = vector.multi_reduction <add>, %31, %cst_15 [1] : vector<12x4xf32> to vector<12xf32>
    %33 = vector.shape_cast %32 : vector<12xf32> to vector<12x1xf32>
    %34 = vector.broadcast %33 : vector<12x1xf32> to vector<12x4xf32>
    %35 = arith.divf %31, %34 : vector<12x4xf32>
    %c0_16 = arith.constant 0 : index
    %c0_17 = arith.constant 0 : index
    %36 = vector.load %arg1[%c0_16, %c0_17] : memref<12x32xf32, #tpu.memory_space<vmem>>, vector<12x32xf32>
    %37 = vector.extract_strided_slice %0 {offsets = [0, 0], sizes = [1, 32], strides = [1, 1]} : vector<4x32xf32> to vector<1x32xf32>
    %38 = vector.broadcast %37 : vector<1x32xf32> to vector<12x32xf32>
    %39 = arith.addf %36, %38 : vector<12x32xf32>
    %40 = vector.extract_strided_slice %35 {offsets = [0, 0], sizes = [12, 1], strides = [1, 1]} : vector<12x4xf32> to vector<12x1xf32>
    %41 = vector.broadcast %40 : vector<12x1xf32> to vector<12x32xf32>
    %42 = arith.mulf %39, %41 : vector<12x32xf32>
    %c0_18 = arith.constant 0 : index
    %c0_19 = arith.constant 0 : index
    %43 = vector.load %arg2[%c0_18, %c0_19] : memref<12x32xf32, #tpu.memory_space<vmem>>, vector<12x32xf32>
    %44 = vector.extract_strided_slice %0 {offsets = [1, 0], sizes = [1, 32], strides = [1, 1]} : vector<4x32xf32> to vector<1x32xf32>
    %45 = vector.broadcast %44 : vector<1x32xf32> to vector<12x32xf32>
    %46 = arith.addf %43, %45 : vector<12x32xf32>
    %47 = vector.extract_strided_slice %35 {offsets = [0, 1], sizes = [12, 1], strides = [1, 1]} : vector<12x4xf32> to vector<12x1xf32>
    %48 = vector.broadcast %47 : vector<12x1xf32> to vector<12x32xf32>
    %49 = arith.mulf %46, %48 : vector<12x32xf32>
    %50 = arith.addf %42, %49 : vector<12x32xf32>
    %c0_20 = arith.constant 0 : index
    %c0_21 = arith.constant 0 : index
    %51 = vector.load %arg3[%c0_20, %c0_21] : memref<12x32xf32, #tpu.memory_space<vmem>>, vector<12x32xf32>
    %52 = vector.extract_strided_slice %0 {offsets = [2, 0], sizes = [1, 32], strides = [1, 1]} : vector<4x32xf32> to vector<1x32xf32>
    %53 = vector.broadcast %52 : vector<1x32xf32> to vector<12x32xf32>
    %54 = arith.addf %51, %53 : vector<12x32xf32>
    %55 = vector.extract_strided_slice %35 {offsets = [0, 2], sizes = [12, 1], strides = [1, 1]} : vector<12x4xf32> to vector<12x1xf32>
    %56 = vector.broadcast %55 : vector<12x1xf32> to vector<12x32xf32>
    %57 = arith.mulf %54, %56 : vector<12x32xf32>
    %58 = arith.addf %50, %57 : vector<12x32xf32>
    %c0_22 = arith.constant 0 : index
    %c0_23 = arith.constant 0 : index
    %59 = vector.load %arg4[%c0_22, %c0_23] : memref<12x32xf32, #tpu.memory_space<vmem>>, vector<12x32xf32>
    %60 = vector.extract_strided_slice %0 {offsets = [3, 0], sizes = [1, 32], strides = [1, 1]} : vector<4x32xf32> to vector<1x32xf32>
    %61 = vector.broadcast %60 : vector<1x32xf32> to vector<12x32xf32>
    %62 = arith.addf %59, %61 : vector<12x32xf32>
    %63 = vector.extract_strided_slice %35 {offsets = [0, 3], sizes = [12, 1], strides = [1, 1]} : vector<12x4xf32> to vector<12x1xf32>
    %64 = vector.broadcast %63 : vector<12x1xf32> to vector<12x32xf32>
    %65 = arith.mulf %62, %64 : vector<12x32xf32>
    %66 = arith.addf %58, %65 : vector<12x32xf32>
    %c0_24 = arith.constant 0 : index
    %c0_25 = arith.constant 0 : index
    %67 = vector.load %arg8[%c0_24, %c0_25] : memref<12x32xf32, #tpu.memory_space<vmem>>, vector<12x32xf32>
    tpu.vector_store %arg8[%c0_24, %c0_25], %66 {strides = array<i32>} : memref<12x32xf32, #tpu.memory_space<vmem>>, vector<12x32xf32>,
    %c0_26 = arith.constant 0 : index
    %c0_27 = arith.constant 0 : index
    %68 = vector.load %arg9[%c0_26, %c0_27] : memref<12x4xf32, #tpu.memory_space<vmem>>, vector<12x4xf32>
    tpu.vector_store %arg9[%c0_26, %c0_27], %35 {strides = array<i32>} : memref<12x4xf32, #tpu.memory_space<vmem>>, vector<12x4xf32>,
    return
  }
  func.func @transform_0(%arg0: i32) -> (i32, i32) {
    %c0_i32 = arith.constant 0 : i32
    %c0_i32_0 = arith.constant 0 : i32
    return %arg0, %c0_i32 : i32, i32
  }
  func.func @transform_1(%arg0: i32) -> (i32, i32) {
    %c0_i32 = arith.constant 0 : i32
    %c0_i32_0 = arith.constant 0 : i32
    return %arg0, %c0_i32 : i32, i32
  }
  func.func @transform_2(%arg0: i32) -> (i32, i32) {
    %c0_i32 = arith.constant 0 : i32
    %c0_i32_0 = arith.constant 0 : i32
    return %arg0, %c0_i32 : i32, i32
  }
  func.func @transform_3(%arg0: i32) -> (i32, i32) {
    %c0_i32 = arith.constant 0 : i32
    %c0_i32_0 = arith.constant 0 : i32
    return %arg0, %c0_i32 : i32, i32
  }
  func.func @transform_4(%arg0: i32) -> (i32, i32) {
    %c0_i32 = arith.constant 0 : i32
    %c0_i32_0 = arith.constant 0 : i32
    %c0_i32_1 = arith.constant 0 : i32
    return %c0_i32, %c0_i32_0 : i32, i32
  }
  func.func @transform_5(%arg0: i32) -> (i32, i32) {
    %c0_i32 = arith.constant 0 : i32
    %c0_i32_0 = arith.constant 0 : i32
    %c0_i32_1 = arith.constant 0 : i32
    return %c0_i32, %c0_i32_0 : i32, i32
  }
  func.func @transform_6(%arg0: i32) -> (i32, i32) {
    %c0_i32 = arith.constant 0 : i32
    %c0_i32_0 = arith.constant 0 : i32
    %c0_i32_1 = arith.constant 0 : i32
    return %c0_i32, %c0_i32_0 : i32, i32
  }
  func.func @transform_7(%arg0: i32) -> (i32, i32) {
    %c0_i32 = arith.constant 0 : i32
    %c0_i32_0 = arith.constant 0 : i32
    return %arg0, %c0_i32 : i32, i32
  }
  func.func @transform_8(%arg0: i32) -> (i32, i32) {
    %c0_i32 = arith.constant 0 : i32
    %c0_i32_0 = arith.constant 0 : i32
    return %arg0, %c0_i32 : i32, i32
  }
}

</mosaic_0001>

<bundles_post_ra>
// kernel: tpu_custom_call.1
= control target key start
LH: loop header
LB: loop body
LE: loop exit
PB: predicated region body
PF: predicated region fallthrough
CT: control target
= control target key end

     0   :  { %14 = vsyncpa [#allocation3], 0  ;;  %s1205_s0 = inlined_call_operand.vmem [shape: f32[12,32], index: 0, kind: input, shape index: {}]   ;;  %s1206_s1 = inlined_call_operand.vmem [shape: f32[12,32], index: 1, kind: input, shape index: {}]   ;;  %s1207_s2 = inlined_call_operand.hbm [shape: f32[12,32], index: 2, kind: input, shape index: {}]   ;;  %s1208_s3 = inlined_call_operand.hbm [shape: f32[12,32], index: 3, kind: input, shape index: {}]   ;;  %s1209_s4 = inlined_call_operand.vmem [shape: f32[32,4], index: 4, kind: input, shape index: {}]   ;;  %s1210_s5 = inlined_call_operand.vmem [shape: f32[1,4], index: 5, kind: input, shape index: {}]   ;;  %s1211_s6 = inlined_call_operand.vmem [shape: f32[4,32], index: 6, kind: input, shape index: {}]   ;;  %s1212_s7 = inlined_call_operand.hbm [shape: f32[12,32], index: 7, kind: output, shape index: {0}]   ;;  %s1213_s8 = inlined_call_operand.vmem [shape: f32[12,4], index: 8, kind: output, shape index: {1}]  }
   0x1   :  { %15 = vsyncpa [#allocation6], 0 }
   0x2   :  { %16 = vsyncpa [#allocation4], 0  ;;  %s1003_s27 = smov [#allocation2]   ;;  %s931_s9 = scalar_lea.hbm %s1207_s2, 256 }
   0x3   :  { %s26_s28 = sshll.u32 %s1003_s27, 4  ;;  %p932_p0 = scmp.ne.s32.totalorder %s1207_s2, %s931_s9  ;;  %s27_s28 = int_to_ptr.vmem [resolvable:$true] %s26_s28 }
   0x4   :  { %p935_p1 = scmp.lt.u32.totalorder %s931_s9, %s1207_s2 }
   0x6   :  { %p937_p2 = pnand %p935_p1, %p932_p0 }
   0x8   :  { %940 = shalt.err (!%p937_p2)
}
   0x9   :  { %s941_s14 = scalar_lea.vmem %s27_s28, 256  ;;  %p946_p4 = scmp.lt.s32.totalorder %s27_s28, %s27_s28 }
   0xa   :  { %p942_p3 = scmp.ne.s32.totalorder %s27_s28, %s941_s14  ;;  %p947_p5 = scmp.lt.s32.totalorder %s941_s14, %s941_s14 }
   0xc   :  { %p948_p6 = por %p947_p5, %p946_p4 }
   0xe   :  { %p949_p7 = pnand %p948_p6, %p942_p3 }
  0x10   :  { %952 = shalt.err (!%p949_p7)
}
  0x11   :  { %s1004_s15 = smov 128   ;;  %s1005_s16 = smov 8  }
  0x12   :  { %32 = dma.hbm_to_vmem [thread:$0]  %s1207_s2, 256, %s27_s28, [#allocation3], %s1004_s15, %s1004_s15, %s1005_s16  }
  0x13   :  { %s1006_s19 = smov [#allocation5]   ;;  %s953_s23 = scalar_lea.hbm %s1208_s3, 256 }
  0x14   :  { %s38_s20 = sshll.u32 %s1006_s19, 4  ;;  %p954_p8 = scmp.ne.s32.totalorder %s1208_s3, %s953_s23  ;;  %s39_s20 = int_to_ptr.vmem [resolvable:$true] %s38_s20 }
  0x15   :  { %p957_p9 = scmp.lt.u32.totalorder %s953_s23, %s1208_s3 }
  0x17   :  { %p959_p10 = pnand %p957_p9, %p954_p8 }
  0x19   :  { %962 = shalt.err (!%p959_p10)
}
  0x1a   :  { %s963_s29 = scalar_lea.vmem %s39_s20, 256  ;;  %p968_p12 = scmp.lt.s32.totalorder %s39_s20, %s39_s20 }
  0x1b   :  { %p964_p11 = scmp.ne.s32.totalorder %s39_s20, %s963_s29  ;;  %p969_p13 = scmp.lt.s32.totalorder %s963_s29, %s963_s29 }
  0x1d   :  { %p970_p0 = por %p969_p13, %p968_p12 }
  0x1f   :  { %p971_p1 = pnand %p970_p0, %p964_p11 }
  0x21   :  { %974 = shalt.err (!%p971_p1)
}
  0x22   :  { %44 = dma.hbm_to_vmem [thread:$0]  %s1208_s3, 256, %s39_s20, [#allocation6], %s1004_s15, %s1004_s15, %s1005_s16  }
  0x23   :  { %997 = dma.done.wait [#allocation3], 256  }
  0x24   :  { %998 = vsyncadd [#allocation3], 4294967040 }
  0x25   :  { %999 = dma.done.wait [#allocation6], 256  }
  0x26   :  { %1000 = vsyncadd [#allocation6], 4294967040  ;;  %v60_v0 = vlaneseq  ;;  %v98_v6 = vld [vmem:[%s1209_s4] sm:$0xff]  ;;  %v99_v7 = vld [vmem:[%s1209_s4 + $0x8] sm:$0xff]  ;;  %vm109_vm0 = vcmask 261120   ;;  %vm644_vm1 = vcmask 31744  }
  0x27   :  { %v100_v8 = vld [vmem:[%s1209_s4 + $0x10] sm:$0xff]  ;;  %v117_v9 = vand.u32 4294901760, %v98_v6  ;;  %v120_v10 = vand.u32 4294901760, %v99_v7  ;;  %v101_v11 = vld [vmem:[%s1209_s4 + $0x18] sm:$0xff]  ;;  %v57_v13 = vld [vmem:[%s1211_s6] sm:$0xf] }
  0x28   :  { %v61_v1 = vshrl.u32 %v60_v0, 7  ;;  %v123_v12 = vand.u32 4294901760, %v100_v8  ;;  %v126_v14 = vand.u32 4294901760, %v101_v11  ;;  %v58_v15 = vld [vmem:[%s1205_s0] sm:$0xff]  ;;  %v86_v22 = vld [vmem:[#allocation5] sm:$0xff]  ;;  %vm648_vm2 = vcmask 27648  }
  0x29   :  { %v66_v17 = vld [vmem:[%s1206_s1] sm:$0xff]  ;;  %v1108_v21 = vpack.c.bf16 %v120_v10, %v117_v9  ;;  %v59_v24 = vld [vmem:[%s1205_s0 + $0x8] sm:$0xf]  ;;  %v1116_v26 = vsub.f32 %v98_v6, %v117_v9  ;;  %v1118_v27 = vsub.f32 %v99_v7, %v120_v10  ;;  %v87_v33 = vld [vmem:[#allocation5 + $0x8] sm:$0xf]  ;;  %vm717_vm3 = vcmask 257024  }
  0x2a   :  { %v62_v2 = vsub.s32 0, %v61_v1  ;;  %v70_v3 = vsub.s32 1, %v61_v1  ;;  %v80_v4 = vsub.s32 2, %v61_v1  ;;  %v90_v5 = vsub.s32 3, %v61_v1  ;;  %v76_v19 = vld [vmem:[#allocation2] sm:$0xff] }
  0x2b   :  { %v67_v25 = vld [vmem:[%s1206_s1 + $0x8] sm:$0xf]  ;;  %v1120_v28 = vpack.c.bf16 %v126_v14, %v123_v12  ;;  %871 = vmatprep.subr.bf16.mxu0 %v1108_v21  ;;  %847 = vmatprep.subr.bf16.mxu1 %v1108_v21  ;;  %v208_v37 = vand.u32 4294901760, %v1116_v26  ;;  %v215_v41 = vand.u32 4294901760, %v1118_v27  ;;  %v221_v44 = vsub.f32 %v100_v8, %v123_v12 }
  0x2c   :  { %v63_v16 = vrot.slane %v57_v13, %v62_v2  ;;  %v71_v18 = vrot.slane %v57_v13, %v70_v3  ;;  %v81_v20 = vrot.slane %v57_v13, %v80_v4  ;;  %v91_v23 = vrot.slane %v57_v13, %v90_v5  ;;  %v77_v32 = vld [vmem:[#allocation2 + $0x8] sm:$0xf]  ;;  %873 = vmatpush3.bf16.msra.mxu0 %v1108_v21 }
  0x2d   :  { %849 = vmatpush3.bf16.msra.mxu1 %v1108_v21  ;;  %875 = vmatprep.subr.bf16.mxu0 %v1120_v28  ;;  %v209_v43 = vsub.f32 %v1116_v26, %v208_v37  ;;  %v878_v46 = vpack.c.bf16 %v215_v41, %v208_v37  ;;  %v216_v47 = vsub.f32 %v1118_v27, %v215_v41  ;;  %v222_v56 = vand.u32 4294901760, %v221_v44 }
  0x2e   :  { %v1122_v29 = vadd.f32 %v63_v16, %v58_v15  ;;  %v1124_v30 = vadd.f32 %v71_v18, %v66_v17  ;;  %v1126_v31 = vadd.f32 %v81_v20, %v76_v19  ;;  %v1130_v34 = vadd.f32 %v91_v23, %v86_v22  ;;  %851 = vmatprep.subr.bf16.mxu1 %v1120_v28  ;;  %v743_v17 = vld [vmem:[%s1210_s5] ss:$0 sm:$0xff] }
  0x2f   :  { %v1132_v35 = vadd.f32 %v63_v16, %v59_v24  ;;  %v1134_v36 = vadd.f32 %v71_v18, %v67_v25  ;;  %v1141_v39 = vadd.f32 %v81_v20, %v77_v32  ;;  %v1143_v40 = vadd.f32 %v91_v23, %v87_v33 }
  0x30   :  { %v74_v38 = vadd.f32 %v1124_v30, %v1122_v29  ;;  %v228_v48 = vsub.f32 %v101_v11, %v126_v14  ;;  %v210_v50 = vand.u32 4294901760, %v209_v43  ;;  %877 = vmatpush3.bf16.msra.mxu0 %v1120_v28  ;;  %v217_v52 = vand.u32 4294901760, %v216_v47 }
  0x31   :  { %v75_v42 = vadd.f32 %v1134_v36, %v1132_v35  ;;  %853 = vmatpush3.bf16.msra.mxu1 %v1120_v28  ;;  %879 = vmatprep.subr.bf16.mxu0 %v878_v46  ;;  %v223_v63 = vsub.f32 %v221_v44, %v222_v56  ;;  %v862_v13 = vpack.c.bf16 %v1118_v27, %v1116_v26 }
  0x32   :  { %v84_v45 = vadd.f32 %v1126_v31, %v74_v38  ;;  %v854_v55 = vpack.c.bf16 %v217_v52, %v210_v50  ;;  %v229_v57 = vand.u32 4294901760, %v228_v48  ;;  %v866_v14 = vpack.c.bf16 %v228_v48, %v221_v44 }
  0x33   :  { %v85_v49 = vadd.f32 %v1141_v39, %v75_v42  ;;  %v224_v6 = vand.u32 4294901760, %v223_v63  ;;  %v1007_v44 = vmov 0   ;;  %v1009_v52 = vmov 1  }
  0x34   :  { %v94_v51 = vadd.f32 %v1130_v34, %v84_v45  ;;  %855 = vmatprep.subr.bf16.mxu1 %v854_v55  ;;  %v230_v0 = vsub.f32 %v228_v48, %v229_v57  ;;  %v882_v5 = vpack.c.bf16 %v229_v57, %v222_v56  ;;  %915 = vset.pattern.permute.xlu0 %v1007_v44 }
  0x35   :  { %v95_v53 = vadd.f32 %v1143_v40, %v85_v49  ;;  %916 = vset.pattern.permute.xlu1 %v1007_v44 }
  0x36   :  { %v96_v54 = vmul.f32 0.25, %v94_v51  ;;  %v231_v7 = vand.u32 4294901760, %v230_v0  ;;  %v1008_v51 = vmov 3  }
  0x37   :  { %v97_v58 = vmul.f32 0.25, %v95_v53  ;;  %v1010_v53 = vmov 2  }
  0x38   :  { %v111_v59 = vsel %vm109_vm0, %v96_v54, 0  ;;  %v858_v12 = vpack.c.bf16 %v231_v7, %v224_v6 }
  0x39   :  { %v185_v60 = vand.u32 4294901760, %v111_v59  ;;  %v114_v61 = vsel %vm109_vm0, %v97_v58, 0 }
  0x3a   :  { %v195_v62 = vand.u32 4294901760, %v114_v61 }
  0x3b   :  { %v186_v1 = vsub.f32 %v111_v59, %v185_v60 }
  0x3c   :  { %v196_v2 = vsub.f32 %v114_v61, %v195_v62 }
  0x3d   :  { %v187_v3 = vand.u32 4294901760, %v186_v1 }
  0x3e   :  { %v197_v4 = vand.u32 4294901760, %v196_v2 }
  0x3f   :  { %821 = vmatprep.mubr.f32.mxu0 %v187_v3  ;;  %v188_v8 = vsub.f32 %v186_v1, %v187_v3 }
  0x40   :  { %822 = vmatmul.mubr.f32.vlgmr.msra.gmra.mrb[0].mxu0 %v197_v4  ;;  %v198_v9 = vsub.f32 %v196_v2, %v197_v4 }
  0x41   :  { %881 = vmatpush3.bf16.msra.mxu0 %v878_v46  ;;  %v189_v10 = vand.u32 4294901760, %v188_v8  ;;  %832 = vmatprep.mubr.f32.mxu0 %v185_v60 }
  0x42   :  { %v199_v11 = vand.u32 4294901760, %v198_v9  ;;  %883 = vmatprep.subr.bf16.mxu0 %v882_v5 }
  0x43   :  { %788 = vmatprep.mubr.f32.mxu1 %v189_v10 }
  0x44   :  { %789 = vmatmul.mubr.f32.vlgmr.msra.gmra.mrb[0].mxu1 %v199_v11 }
  0x45   :  { %857 = vmatpush3.bf16.msra.mxu1 %v854_v55  ;;  %885 = vmatpush3.bf16.msra.mxu0 %v882_v5 }
  0x46   :  { %859 = vmatprep.subr.bf16.mxu1 %v858_v12  ;;  %887 = vmatprep.subr.bf16.mxu0 %v1108_v21 }
  0x47   :  { %799 = vmatprep.mubr.f32.mxu1 %v185_v60 }
  0x48   :  { %833 = vmatmul.mubr.f32.vlgmr.msra.gmra.mrb[0].mxu0 %v195_v62 }
  0x49   :  { %861 = vmatpush3.bf16.msra.mxu1 %v858_v12  ;;  %889 = vmatpush3.bf16.msra.mxu0 %v1108_v21 }
  0x4a   :  { %863 = vmatprep.subr.bf16.mxu1 %v862_v13  ;;  %891 = vmatprep.subr.bf16.mxu0 %v1120_v28 }
  0x4b   :  { %843 = vmatprep.mubr.f32.mxu0 %v185_v60 }
  0x4c   :  { %800 = vmatmul.mubr.f32.vlgmr.msra.gmra.mrb[0].mxu1 %v195_v62 }
  0x4d   :  { %865 = vmatpush3.bf16.msra.mxu1 %v862_v13  ;;  %893 = vmatpush3.bf16.msra.mxu0 %v1120_v28 }
  0x4e   :  { %867 = vmatprep.subr.bf16.mxu1 %v866_v14  ;;  %810 = vmatprep.mubr.f32.mxu1 %v186_v1 }
  0x50   :  { %844 = vmatmul.mubr.f32.vlgmr.msra.gmra.mrb[0].mxu0 %v195_v62 }
  0x51   :  { %869 = vmatpush3.bf16.msra.mxu1 %v866_v14 }
  0x54   :  { %811 = vmatmul.mubr.f32.vlgmr.msra.gmra.mrb[0].mxu1 %v196_v2 }
 0x123   :  { %v845_v15 = vpop.f32.mrb[0].mxu0 }
 0x124   :  { %v634_v16 = vpop.f32.mrb[1].mxu0 }
 0x127   :  { %v812_v18 = vpop.f32.mrb[0].mxu1 }
 0x128   :  { %v894_v19 = vadd.f32 %v812_v18, %v743_v17  ;;  %v378_v20 = vpop.f32.mrb[1].mxu1 }
 0x129   :  { %v896_v21 = vadd.f32 %v743_v17, %v378_v20 }
 0x12a   :  { %v895_v22 = vadd.f32 %v894_v19, %v845_v15 }
 0x12b   :  { %v897_v23 = vadd.f32 %v896_v21, %v634_v16 }
 0x12c   :  { %v649_v25 = vsel %vm648_vm2, %v895_v22, -inf }
 0x12d   :  { %v645_v24 = vsel %vm644_vm1, %v897_v23, -inf }
 0x12e   :  { %646 = vmax.xlane.f32.xlu0 %v645_v24 }
 0x132   :  { %650 = vmax.xlane.f32.xlu0 %v649_v25 }
 0x1bb   :  { %v647_v26 = vpop.xlane.xlu0 %646 }
 0x1bc   :  { %v652_v27 = vsub.f32 %v897_v23, %v647_v26 }
 0x1be   :  { %v654_v28 = vmul.f32 1.442695, %v652_v27 }
 0x1bf   :  { %v651_v32 = vpop.xlane.xlu0 %650 }
 0x1c0   :  { %923 = vpow2.f32 %v654_v28  ;;  %v653_v33 = vsub.f32 %v895_v22, %v651_v32 }
 0x1c2   :  { %v656_v37 = vmul.f32 1.442695, %v653_v33 }
 0x1c4   :  { %925 = vpow2.f32 %v656_v37 }
 0x1ca   :  { %v924_v38 = vpop.eup %923 }
 0x1cb   :  { %v658_v41 = vsel %vm644_vm1, %v924_v38, 0.0 }
 0x1cc   :  { %659 = vadd.xlane.f32.xlu1 %v658_v41 }
 0x1ce   :  { %v926_v42 = vpop.eup %925 }
 0x1cf   :  { %v661_v43 = vsel %vm648_vm2, %v926_v42, 0.0 }
 0x1d0   :  { %662 = vadd.xlane.f32.xlu1 %v661_v43 }
 0x259   :  { %v660_v45 = vpop.xlane.xlu1 %659 }
 0x25a   :  { %927 = vrcp.f32 %v660_v45 }
 0x25d   :  { %v663_v46 = vpop.xlane.xlu1 %662 }
 0x25e   :  { %929 = vrcp.f32 %v663_v46 }
 0x264   :  { %v928_v47 = vpop.eup %927 }
 0x265   :  { %v665_v48 = vmul.f32 %v928_v47, %v924_v38 }
 0x267   :  { %719 = vst.msk [vmem:[%s1213_s8] sm:$0xff] %vm644_vm1, %v665_v48  ;;  %670 = vperm.xlu0 %915, %v665_v48  }
 0x268   :  { %v930_v49 = vpop.eup %929 }
 0x269   :  { %v667_v50 = vmul.f32 %v930_v49, %v926_v42 }
 0x26b   :  { %720 = vst.msk [vmem:[%s1213_s8 + $0x8] sm:$0xf] %vm648_vm2, %v667_v50  ;;  %675 = vperm.xlu1 %916, %v667_v50   ;;  %922 = vset.pattern.permute.xlu0 %v1008_v51  ;;  %s1011_s8 = smov [#allocation7]  }
 0x26c   :  { %s726_s29 = sshll.u32 %s1011_s8, 4  ;;  %s727_s29 = int_to_ptr.vmem [resolvable:$true] %s726_s29 }
 0x26d   :  { %s975_s2 = scalar_lea.vmem %s727_s29, 256  ;;  %p980_p3 = scmp.lt.s32.totalorder %s727_s29, %s727_s29 }
 0x26e   :  { %p976_p2 = scmp.ne.s32.totalorder %s727_s29, %s975_s2  ;;  %p981_p4 = scmp.lt.s32.totalorder %s975_s2, %s975_s2 }
 0x26f   :  { %917 = vset.pattern.permute.xlu1 %v1009_v52 }
 0x270   :  { %685 = vperm.xlu1 %917, %v667_v50   ;;  %p982_p5 = por %p981_p4, %p980_p3 }
 0x272   :  { %p983_p6 = pnand %p982_p5, %p976_p2 }
 0x274   :  { %918 = vset.pattern.permute.xlu1 %v1010_v53 }
 0x275   :  { %697 = vperm.xlu1 %918, %v667_v50  }
 0x279   :  { %919 = vset.pattern.permute.xlu1 %v1009_v52 }
 0x27a   :  { %681 = vperm.xlu1 %919, %v665_v48  }
 0x27e   :  { %920 = vset.pattern.permute.xlu1 %v1010_v53 }
 0x27f   :  { %693 = vperm.xlu1 %920, %v665_v48  }
 0x283   :  { %921 = vset.pattern.permute.xlu1 %v1008_v51 }
 0x284   :  { %705 = vperm.xlu1 %921, %v665_v48  }
 0x288   :  { %709 = vperm.xlu1 %921, %v667_v50  }
 0x2e6   :  { %v671_v58 = vpop.permute.xlu0 %670 }
 0x2e7   :  { %v678_v61 = vmul.f32 %v671_v58, %v1122_v29 }
 0x2ea   :  { %v676_v54 = vpop.permute.xlu1 %675 }
 0x2eb   :  { %v679_v2 = vmul.f32 %v676_v54, %v1132_v35 }
 0x2ef   :  { %v686_v55 = vpop.permute.xlu1 %685 }
 0x2f0   :  { %v689_v63 = vmul.f32 %v686_v55, %v1134_v36 }
 0x2f2   :  { %v691_v6 = vadd.f32 %v689_v63, %v679_v2 }
 0x2f4   :  { %v698_v56 = vpop.permute.xlu1 %697 }
 0x2f5   :  { %v701_v3 = vmul.f32 %v698_v56, %v1141_v39 }
 0x2f9   :  { %v682_v57 = vpop.permute.xlu1 %681 }
 0x2fa   :  { %v688_v59 = vmul.f32 %v682_v57, %v1124_v30  ;;  %v703_v30 = vadd.f32 %v701_v3, %v691_v6 }
 0x2fc   :  { %v690_v0 = vadd.f32 %v688_v59, %v678_v61 }
 0x2fe   :  { %v694_v60 = vpop.permute.xlu1 %693 }
 0x2ff   :  { %v700_v62 = vmul.f32 %v694_v60, %v1126_v31 }
 0x301   :  { %v702_v4 = vadd.f32 %v700_v62, %v690_v0 }
 0x303   :  { %v706_v1 = vpop.permute.xlu1 %705 }
 0x304   :  { %v712_v5 = vmul.f32 %v706_v1, %v1130_v34 }
 0x306   :  { %v714_v7 = vadd.f32 %v712_v5, %v702_v4 }
 0x307   :  { %v710_v8 = vpop.permute.xlu1 %709 }
 0x308   :  { %716 = vst.msk [vmem:[#allocation7] sm:$0xff] %vm109_vm0, %v714_v7  ;;  %v713_v29 = vmul.f32 %v710_v8, %v1143_v40 }
 0x30a   :  { %v715_v31 = vadd.f32 %v713_v29, %v703_v30 }
 0x30c   :  { %718 = vst.msk [vmem:[#allocation7 + $0x8] sm:$0xf] %vm717_vm3, %v715_v31 }
 0x30d   :  { %986 = shalt.err (!%p983_p6)
}
 0x30e   :  { %s987_s9 = scalar_lea.hbm %s1212_s7, 256 }
 0x30f   :  { %p988_p7 = scmp.ne.s32.totalorder %s1212_s7, %s987_s9  ;;  %p991_p8 = scmp.lt.u32.totalorder %s987_s9, %s1212_s7 }
 0x311   :  { %p993_p9 = pnand %p991_p8, %p988_p7 }
 0x313   :  { %996 = shalt.err (!%p993_p9)
}
 0x314   :  { %732 = dma.vmem_to_hbm [thread:$0]  %s727_s29, 256, %s1212_s7, [#allocation4], %s1004_s15, %s1004_s15, %s1005_s16  }
 0x315   :  { %1001 = dma.done.wait [#allocation4], 256  }
 0x316   :  { %1002 = vsyncadd [#allocation4], 4294967040 }
 0x317   :  { %740 = vsyncpa [#allocation3], 1 }
 0x318   :  { %741 = vsyncpa [#allocation6], 1 }
 0x319   :  { %742 = vsyncpa [#allocation4], 1 }

</bundles_post_ra>
